<compile_context>
chip_gen: v7x
topology: tpu7x:2x2x1
jax: 0.10.0
libtpu: 0.0.40
codegen_flags: <defaults>
</compile_context>

<pallas_src>
import jax
import jax.numpy as jnp
from jax import lax
from jax.experimental import pallas as pl
from jax.experimental.pallas import tpu as pltpu


_NEG_SLOPE = 0.01  # nn.LeakyReLU default negative slope


def _round_up(x, m):
    return (x + m - 1) // m * m


def _make_q_kernel(feat_dims, hidden, hidden2):
    """Kernel over one batch tile: in_refs[i] (TB, d_i) -> o_ref (1, TB)."""
    n_in = len(feat_dims)

    def kernel(*refs):
        in_refs = refs[:n_in]
        w1_ref, w2_ref, sm_ref = refs[n_in:n_in + 3]
        o_ref = refs[n_in + 3]

        H, H2 = hidden, hidden2
        w1 = w1_ref[...]                        # (D_in, H), compute dtype
        sm = sm_ref[...]                        # (1, H + 2*H2 + 1), f32
        b1 = sm[:, 0:H]                         # (1, H)
        b2 = sm[:, H:H + H2]                    # (1, H2)
        w3t = sm[:, H + H2:H + 2 * H2]          # (1, H2)  == W3^T
        b3 = sm[:, H + 2 * H2:H + 2 * H2 + 1]   # (1, 1)

        # ---- layer 1: x @ W1 + b1 without materializing x = cat(s..., a...)
        h1 = None
        off = 0
        for r, d in zip(in_refs, feat_dims):
            part = jnp.dot(r[...], w1[off:off + d, :],
                           preferred_element_type=jnp.float32)
            h1 = part if h1 is None else h1 + part
            off += d
        h1 = h1 + b1
        h1 = jnp.where(h1 > 0, h1, _NEG_SLOPE * h1)           # LeakyReLU

        # ---- layer 2
        h2 = jnp.dot(h1.astype(w2_ref.dtype), w2_ref[...],
                     preferred_element_type=jnp.float32) + b2
        h2 = jnp.where(h2 > 0, h2, _NEG_SLOPE * h2)           # LeakyReLU

        # ---- layer 3: lane-dense (1, TB) row, batch on lanes
        # out[0, b] = sum_k W3[k, 0] * h2[b, k]  + b3
        out = lax.dot_general(
            w3t, h2,
            dimension_numbers=(((1,), (1,)), ((), ())),
            preferred_element_type=jnp.float32) + b3
        o_ref[...] = out.astype(o_ref.dtype)

    return kernel


def q_forward(s_list, a_list, params, *, compute_dtype=jnp.float32, block_b=512):
    """Pallas implementation of Q.forward(s, a). Returns (B, 1) float32."""
    w1, b1, w2, b2, w3, b3 = params
    inputs = list(s_list) + list(a_list)
    feat_dims = tuple(int(v.shape[1]) for v in inputs)
    B = int(inputs[0].shape[0])
    H = int(w1.shape[1])
    H2 = int(w2.shape[1])

    # Batch tiling: a single full-extent tile for small B, otherwise tiles of
    # block_b rows (multiple of 128 so the lane-dense output block is aligned).
    if B <= block_b:
        tb = _round_up(B, 8)
        b_pad = tb
    else:
        tb = block_b
        b_pad = _round_up(B, tb)

    def prep(v):
        v = v.astype(compute_dtype)
        if b_pad != B:
            v = jnp.pad(v, ((0, b_pad - B), (0, 0)))
        return v

    inputs = [prep(v) for v in inputs]
    w1c = w1.astype(compute_dtype)
    w2c = w2.astype(compute_dtype)
    # Pack biases + transposed last-layer weight into one tiny f32 operand.
    small = jnp.concatenate(
        [b1.reshape(1, H), b2.reshape(1, H2),
         w3.reshape(1, H2), b3.reshape(1, 1)], axis=1).astype(jnp.float32)

    grid = (b_pad // tb,)
    in_specs = (
        [pl.BlockSpec((tb, d), lambda i: (i, 0)) for d in feat_dims]
        + [pl.BlockSpec(tuple(w1c.shape), lambda i: (0, 0)),
           pl.BlockSpec(tuple(w2c.shape), lambda i: (0, 0)),
           pl.BlockSpec(tuple(small.shape), lambda i: (0, 0))]
    )
    out_spec = pl.BlockSpec((1, tb), lambda i: (0, i))

    out = pl.pallas_call(
        _make_q_kernel(feat_dims, H, H2),
        out_shape=jax.ShapeDtypeStruct((1, b_pad), jnp.float32),
        grid=grid,
        in_specs=in_specs,
        out_specs=out_spec,
        compiler_params=pltpu.CompilerParams(
            dimension_semantics=("parallel",)),
    )(*inputs, w1c, w2c, small)

    return out[0, :B].reshape(B, 1)


def init_q_params(key, d_in, hidden):
    """Synthetic parameters matching nn.Linear shapes.

    PyTorch nn.Linear(in, out) weight is (out, in); we store the transpose
    (in, out) so the kernel does x @ W. Biases stored as (1, out) rows.
    """
    h2 = hidden // 2
    ks = jax.random.split(key, 6)

    def lin(kw, kb, fan_in, fan_out):
        bound = 1.0 / jnp.sqrt(jnp.float32(fan_in))
        w = jax.random.uniform(kw, (fan_in, fan_out), jnp.float32, -bound, bound)
        b = jax.random.uniform(kb, (1, fan_out), jnp.float32, -bound, bound)
        return w, b

    w1, b1 = lin(ks[0], ks[1], d_in, hidden)
    w2, b2 = lin(ks[2], ks[3], hidden, h2)
    w3, b3 = lin(ks[4], ks[5], h2, 1)
    return (w1, b1, w2, b2, w3, b3)


def q_reference(s_list, a_list, params, compute_dtype=jnp.float32):
    """Pure-JAX reference mirroring the kernel's dtype handling.

    With compute_dtype=float32 this is exactly the PyTorch module's math.
    """
    w1, b1, w2, b2, w3, b3 = params
    x = jnp.concatenate(
        [jnp.concatenate(s_list, axis=1), jnp.concatenate(a_list, axis=1)],
        axis=1).astype(compute_dtype)
    leaky = lambda v: jnp.where(v > 0, v, _NEG_SLOPE * v)
    h1 = leaky(jnp.dot(x, w1.astype(compute_dtype),
                       preferred_element_type=jnp.float32) + b1)
    h2 = leaky(jnp.dot(h1.astype(compute_dtype), w2.astype(compute_dtype),
                       preferred_element_type=jnp.float32) + b2)
    return jnp.dot(h2, w3, preferred_element_type=jnp.float32) + b3


if __name__ == "__main__":
    key = jax.random.PRNGKey(0)

    # Small MADDPG setup: 2 agents, per-agent obs dim 8, action dim 4.
    B = 2
    s_dim = [8, 8]
    a_dim = [4, 4]
    hidden_size_q = 32
    d_in = sum(s_dim) + sum(a_dim)          # 24

    k_params, k_s0, k_s1, k_a0, k_a1, k_big = jax.random.split(key, 6)
    params = init_q_params(k_params, d_in, hidden_size_q)

    s_list = [jax.random.normal(k_s0, (B, s_dim[0]), jnp.float32),
              jax.random.normal(k_s1, (B, s_dim[1]), jnp.float32)]
    a_list = [jax.random.normal(k_a0, (B, a_dim[0]), jnp.float32),
              jax.random.normal(k_a1, (B, a_dim[1]), jnp.float32)]

    # 1) exact float32 path (matches PyTorch numerics)
    out = jax.block_until_ready(q_forward(s_list, a_list, params))
    ref = q_reference(s_list, a_list, params)
    assert out.shape == (B, 1)
    assert jnp.allclose(out, ref, atol=1e-5, rtol=1e-5), (out, ref)

    # 2) bf16 compute path (halves activation HBM traffic, f32 accumulation)
    out_bf = jax.block_until_ready(
        q_forward(s_list, a_list, params, compute_dtype=jnp.bfloat16))
    ref_bf = q_reference(s_list, a_list, params, compute_dtype=jnp.bfloat16)
    assert jnp.allclose(out_bf, ref_bf, atol=1e-2, rtol=1e-2), (out_bf, ref_bf)

    # 3) multi-tile / padded-batch path (grid > 1, lane-dense tiled output)
    Bb = 300
    kb_s0, kb_s1, kb_a0, kb_a1 = jax.random.split(k_big, 4)
    s_big = [jax.random.normal(kb_s0, (Bb, s_dim[0]), jnp.float32),
             jax.random.normal(kb_s1, (Bb, s_dim[1]), jnp.float32)]
    a_big = [jax.random.normal(kb_a0, (Bb, a_dim[0]), jnp.float32),
             jax.random.normal(kb_a1, (Bb, a_dim[1]), jnp.float32)]
    out_big = jax.block_until_ready(
        q_forward(s_big, a_big, params, block_b=128))
    ref_big = q_reference(s_big, a_big, params)
    assert out_big.shape == (Bb, 1)
    assert jnp.allclose(out_big, ref_big, atol=1e-4, rtol=1e-4), "big-batch mismatch"

    print("KERNEL_OK")
</pallas_src>

<mosaic_0001>
module attributes {stable_mosaic.version = 11 : i64} {
  func.func @kernel(%arg0: i32, %arg1: memref<8x8xf32, #tpu.memory_space<vmem>>, %arg2: memref<8x8xf32, #tpu.memory_space<vmem>>, %arg3: memref<8x4xf32, #tpu.memory_space<vmem>>, %arg4: memref<8x4xf32, #tpu.memory_space<vmem>>, %arg5: memref<24x32xf32, #tpu.memory_space<vmem>>, %arg6: memref<32x16xf32, #tpu.memory_space<vmem>>, %arg7: memref<1x65xf32, #tpu.memory_space<vmem>>, %arg8: memref<1x8xf32, #tpu.memory_space<vmem>>) attributes {dimension_semantics = [#tpu.dimension_semantics<parallel>], iteration_bounds = array<i64: 1>, scalar_prefetch = 0 : i64, scratch_operands = 0 : i64, tpu.core_type = #tpu.core_type<tc>, window_params = [{transform_indices = @transform_0, window_bounds = array<i64: 8, 8>}, {transform_indices = @transform_1, window_bounds = array<i64: 8, 8>}, {transform_indices = @transform_2, window_bounds = array<i64: 8, 4>}, {transform_indices = @transform_3, window_bounds = array<i64: 8, 4>}, {pipeline_mode = #tpu.pipeline_mode<synchronous>, transform_indices = @transform_4, window_bounds = array<i64: 24, 32>}, {pipeline_mode = #tpu.pipeline_mode<synchronous>, transform_indices = @transform_5, window_bounds = array<i64: 32, 16>}, {pipeline_mode = #tpu.pipeline_mode<synchronous>, transform_indices = @transform_6, window_bounds = array<i64: 1, 65>}, {transform_indices = @transform_7, window_bounds = array<i64: 1, 8>}]} {
    %c0 = arith.constant 0 : index
    %c0_0 = arith.constant 0 : index
    %0 = vector.load %arg5[%c0, %c0_0] : memref<24x32xf32, #tpu.memory_space<vmem>>, vector<24x32xf32>
    %c0_1 = arith.constant 0 : index
    %c0_2 = arith.constant 0 : index
    %1 = vector.load %arg7[%c0_1, %c0_2] : memref<1x65xf32, #tpu.memory_space<vmem>>, vector<1x65xf32>
    %2 = vector.extract_strided_slice %1 {offsets = [0, 0], sizes = [1, 32], strides = [1, 1]} : vector<1x65xf32> to vector<1x32xf32>
    %3 = vector.extract_strided_slice %1 {offsets = [0, 32], sizes = [1, 16], strides = [1, 1]} : vector<1x65xf32> to vector<1x16xf32>
    %4 = vector.extract_strided_slice %1 {offsets = [0, 48], sizes = [1, 16], strides = [1, 1]} : vector<1x65xf32> to vector<1x16xf32>
    %5 = vector.extract_strided_slice %1 {offsets = [0, 64], sizes = [1, 1], strides = [1, 1]} : vector<1x65xf32> to vector<1x1xf32>
    %c0_3 = arith.constant 0 : index
    %c0_4 = arith.constant 0 : index
    %6 = vector.load %arg1[%c0_3, %c0_4] : memref<8x8xf32, #tpu.memory_space<vmem>>, vector<8x8xf32>
    %7 = vector.extract_strided_slice %0 {offsets = [0, 0], sizes = [8, 32], strides = [1, 1]} : vector<24x32xf32> to vector<8x32xf32>
    %cst = arith.constant dense<0.000000e+00> : vector<8x32xf32>
    %8 = tpu.matmul %6, %7, %cst {dimension_numbers = #tpu.dot_dimension_numbers<[1], [0], [0], [1], [0, 0, 1, 1], [], []>} : vector<8x8xf32>, vector<8x32xf32>, vector<8x32xf32> -> vector<8x32xf32>
    %c0_5 = arith.constant 0 : index
    %c0_6 = arith.constant 0 : index
    %9 = vector.load %arg2[%c0_5, %c0_6] : memref<8x8xf32, #tpu.memory_space<vmem>>, vector<8x8xf32>
    %10 = vector.extract_strided_slice %0 {offsets = [8, 0], sizes = [8, 32], strides = [1, 1]} : vector<24x32xf32> to vector<8x32xf32>
    %cst_7 = arith.constant dense<0.000000e+00> : vector<8x32xf32>
    %11 = tpu.matmul %9, %10, %cst_7 {dimension_numbers = #tpu.dot_dimension_numbers<[1], [0], [0], [1], [0, 0, 1, 1], [], []>} : vector<8x8xf32>, vector<8x32xf32>, vector<8x32xf32> -> vector<8x32xf32>
    %12 = arith.addf %8, %11 : vector<8x32xf32>
    %c0_8 = arith.constant 0 : index
    %c0_9 = arith.constant 0 : index
    %13 = vector.load %arg3[%c0_8, %c0_9] : memref<8x4xf32, #tpu.memory_space<vmem>>, vector<8x4xf32>
    %14 = vector.extract_strided_slice %0 {offsets = [16, 0], sizes = [4, 32], strides = [1, 1]} : vector<24x32xf32> to vector<4x32xf32>
    %cst_10 = arith.constant dense<0.000000e+00> : vector<8x32xf32>
    %15 = tpu.matmul %13, %14, %cst_10 {dimension_numbers = #tpu.dot_dimension_numbers<[1], [0], [0], [1], [0, 0, 1, 1], [], []>} : vector<8x4xf32>, vector<4x32xf32>, vector<8x32xf32> -> vector<8x32xf32>
    %16 = arith.addf %12, %15 : vector<8x32xf32>
    %c0_11 = arith.constant 0 : index
    %c0_12 = arith.constant 0 : index
    %17 = vector.load %arg4[%c0_11, %c0_12] : memref<8x4xf32, #tpu.memory_space<vmem>>, vector<8x4xf32>
    %18 = vector.extract_strided_slice %0 {offsets = [20, 0], sizes = [4, 32], strides = [1, 1]} : vector<24x32xf32> to vector<4x32xf32>
    %cst_13 = arith.constant dense<0.000000e+00> : vector<8x32xf32>
    %19 = tpu.matmul %17, %18, %cst_13 {dimension_numbers = #tpu.dot_dimension_numbers<[1], [0], [0], [1], [0, 0, 1, 1], [], []>} : vector<8x4xf32>, vector<4x32xf32>, vector<8x32xf32> -> vector<8x32xf32>
    %20 = arith.addf %16, %19 : vector<8x32xf32>
    %21 = vector.broadcast %2 : vector<1x32xf32> to vector<8x32xf32>
    %22 = arith.addf %20, %21 : vector<8x32xf32>
    %cst_14 = arith.constant 0.000000e+00 : f32
    %23 = vector.broadcast %cst_14 : f32 to vector<8x32xf32>
    %24 = arith.cmpf ogt, %22, %23 : vector<8x32xf32>
    %cst_15 = arith.constant 0.00999999977 : f32
    %25 = vector.broadcast %cst_15 : f32 to vector<8x32xf32>
    %26 = arith.mulf %25, %22 : vector<8x32xf32>
    %27 = arith.select %24, %22, %26 : vector<8x32xi1>, vector<8x32xf32>
    %c0_16 = arith.constant 0 : index
    %c0_17 = arith.constant 0 : index
    %28 = vector.load %arg6[%c0_16, %c0_17] : memref<32x16xf32, #tpu.memory_space<vmem>>, vector<32x16xf32>
    %cst_18 = arith.constant dense<0.000000e+00> : vector<8x16xf32>
    %29 = tpu.matmul %27, %28, %cst_18 {dimension_numbers = #tpu.dot_dimension_numbers<[1], [0], [0], [1], [0, 0, 1, 1], [], []>} : vector<8x32xf32>, vector<32x16xf32>, vector<8x16xf32> -> vector<8x16xf32>
    %30 = vector.broadcast %3 : vector<1x16xf32> to vector<8x16xf32>
    %31 = arith.addf %29, %30 : vector<8x16xf32>
    %cst_19 = arith.constant 0.000000e+00 : f32
    %32 = vector.broadcast %cst_19 : f32 to vector<8x16xf32>
    %33 = arith.cmpf ogt, %31, %32 : vector<8x16xf32>
    %cst_20 = arith.constant 0.00999999977 : f32
    %34 = vector.broadcast %cst_20 : f32 to vector<8x16xf32>
    %35 = arith.mulf %34, %31 : vector<8x16xf32>
    %36 = arith.select %33, %31, %35 : vector<8x16xi1>, vector<8x16xf32>
    %cst_21 = arith.constant dense<0.000000e+00> : vector<1x8xf32>
    %37 = tpu.matmul %4, %36, %cst_21 {dimension_numbers = #tpu.dot_dimension_numbers<[1], [1], [0], [0], [0, 0, 1, 0], [], []>} : vector<1x16xf32>, vector<8x16xf32>, vector<1x8xf32> -> vector<1x8xf32>
    %38 = vector.broadcast %5 : vector<1x1xf32> to vector<1x8xf32>
    %39 = arith.addf %37, %38 : vector<1x8xf32>
    %c0_22 = arith.constant 0 : index
    %c0_23 = arith.constant 0 : index
    %40 = vector.load %arg8[%c0_22, %c0_23] : memref<1x8xf32, #tpu.memory_space<vmem>>, vector<1x8xf32>
    tpu.vector_store %arg8[%c0_22, %c0_23], %39 {strides = array<i32>} : memref<1x8xf32, #tpu.memory_space<vmem>>, vector<1x8xf32>,
    return
  }
  func.func @transform_0(%arg0: i32) -> (i32, i32) {
    %c0_i32 = arith.constant 0 : i32
    %c0_i32_0 = arith.constant 0 : i32
    return %arg0, %c0_i32 : i32, i32
  }
  func.func @transform_1(%arg0: i32) -> (i32, i32) {
    %c0_i32 = arith.constant 0 : i32
    %c0_i32_0 = arith.constant 0 : i32
    return %arg0, %c0_i32 : i32, i32
  }
  func.func @transform_2(%arg0: i32) -> (i32, i32) {
    %c0_i32 = arith.constant 0 : i32
    %c0_i32_0 = arith.constant 0 : i32
    return %arg0, %c0_i32 : i32, i32
  }
  func.func @transform_3(%arg0: i32) -> (i32, i32) {
    %c0_i32 = arith.constant 0 : i32
    %c0_i32_0 = arith.constant 0 : i32
    return %arg0, %c0_i32 : i32, i32
  }
  func.func @transform_4(%arg0: i32) -> (i32, i32) {
    %c0_i32 = arith.constant 0 : i32
    %c0_i32_0 = arith.constant 0 : i32
    %c0_i32_1 = arith.constant 0 : i32
    return %c0_i32, %c0_i32_0 : i32, i32
  }
  func.func @transform_5(%arg0: i32) -> (i32, i32) {
    %c0_i32 = arith.constant 0 : i32
    %c0_i32_0 = arith.constant 0 : i32
    %c0_i32_1 = arith.constant 0 : i32
    return %c0_i32, %c0_i32_0 : i32, i32
  }
  func.func @transform_6(%arg0: i32) -> (i32, i32) {
    %c0_i32 = arith.constant 0 : i32
    %c0_i32_0 = arith.constant 0 : i32
    %c0_i32_1 = arith.constant 0 : i32
    return %c0_i32, %c0_i32_0 : i32, i32
  }
  func.func @transform_7(%arg0: i32) -> (i32, i32) {
    %c0_i32 = arith.constant 0 : i32
    %c0_i32_0 = arith.constant 0 : i32
    return %c0_i32, %arg0 : i32, i32
  }
}

</mosaic_0001>

<bundles_post_ra>
// kernel: tpu_custom_call.1
= control target key start
LH: loop header
LB: loop body
LE: loop exit
PB: predicated region body
PF: predicated region fallthrough
CT: control target
= control target key end

     0   :  { %v633_v2 = vmov 0.0   ;;  %vm33_vm0 = vcmask 64512   ;;  %vm634_vm1 = vmmov 0   ;;  %s734_s0 = inlined_call_operand.vmem [shape: f32[8,8], index: 0, kind: input, shape index: {}]   ;;  %s735_s1 = inlined_call_operand.vmem [shape: f32[8,8], index: 1, kind: input, shape index: {}]   ;;  %s736_s2 = inlined_call_operand.vmem [shape: f32[8,4], index: 2, kind: input, shape index: {}]   ;;  %s737_s3 = inlined_call_operand.vmem [shape: f32[8,4], index: 3, kind: input, shape index: {}]   ;;  %s738_s4 = inlined_call_operand.vmem [shape: f32[24,32], index: 4, kind: input, shape index: {}]   ;;  %s739_s5 = inlined_call_operand.vmem [shape: f32[32,16], index: 5, kind: input, shape index: {}]   ;;  %s740_s6 = inlined_call_operand.vmem [shape: f32[1,65], index: 6, kind: input, shape index: {}]   ;;  %s741_s7 = inlined_call_operand.hbm [shape: f32[1,8], index: 7, kind: output, shape index: {}]  }
   0x1   :  { %v28_v0 = vld [vmem:[%s738_s4 + $0x8] sm:$0xff]  ;;  %v27_v1 = vld [vmem:[%s738_s4] sm:$0xff]  ;;  %558 = vmatprep.subr.mxu0 %v633_v2  ;;  %563 = vmatprep.subr.mxu1 %v633_v2  ;;  %v29_v5 = vld [vmem:[%s738_s4 + $0x10] sm:$0xff] }
   0x2   :  { %v32_v3 = vld [vmem:[%s735_s1] sm:$0xff]  ;;  %559 = vmatpush3.msra.mxu0 %v28_v0  ;;  %560 = vmatprep.mubr.msk.f32.mxu0 %vm634_vm1, %v633_v2 }
   0x3   :  { %v31_v4 = vld [vmem:[%s734_s0] sm:$0xff] }
   0x4   :  { %12 = vsyncpa [#allocation3], 0  ;;  %564 = vmatpush3.msra.mxu1 %v27_v1  ;;  %565 = vmatprep.mubr.msk.f32.mxu1 %vm634_vm1, %v633_v2  ;;  %vm185_vm2 = vcmask 1043456   ;;  %v261_v6 = vrot.slane %v29_v5, 4  ;;  %v180_v7 = vld [vmem:[%s736_s2] sm:$0xff]  ;;  %vm181_vm3 = vcmask 31744   ;;  %v339_v9 = vlaneseq }
   0x5   :  { %561 = vmatmul.mubr.msk.f32.vlgmr.msra.gmra.mrb[0].mxu0 %vm33_vm0, %v32_v3  ;;  %566 = vmatmul.mubr.msk.f32.vlgmr.msra.gmra.mrb[0].mxu1 %vm33_vm0, %v31_v4  ;;  %v260_v8 = vld [vmem:[%s737_s3] sm:$0xff]  ;;  %v349_v11 = vld [vmem:[%s739_s5 + $0x8] sm:$0xff]  ;;  %v635_v14 = vmov 0.0|0.0   ;;  %v350_v15 = vld [vmem:[%s739_s5 + $0x10] sm:$0xff]  ;;  %s636_s20 = smov 96   ;;  %s637_s21 = smov 80  }
   0x6   :  { %568 = vmatprep.subr.mxu0 %v633_v2  ;;  %573 = vmatprep.subr.mxu1 %v633_v2  ;;  %v348_v10 = vld [vmem:[%s739_s5] sm:$0xff]  ;;  %v340_v12 = vshrl.u32 %v339_v9, 7  ;;  %v351_v16 = vld [vmem:[%s739_s5 + $0x18] sm:$0xff]  ;;  %vm355_vm5 = vcmask 261120   ;;  %v638_v35 = vmov 64   ;;  %vm442_vm7 = vcmask 130048  }
   0x7   :  { %569 = vmatpush3.msk.msra.mxu0 %vm185_vm2, %v29_v5  ;;  %570 = vmatprep.mubr.msk.f32.mxu0 %vm634_vm1, %v633_v2  ;;  %v595_v13 = vpack.c.bf16 %v349_v11, %v348_v10  ;;  %v598_v18 = vpack.c.bf16 %v351_v16, %v350_v15  ;;  %v30_v19 = vld [vmem:[%s740_s6] sm:$0x1]  ;;  %s639_s5 = smov [#allocation2]   ;;  %vm518_vm8 = vcmask 57344  }
   0x8   :  { %574 = vmatpush3.msk.msra.mxu1 %vm185_vm2, %v261_v6  ;;  %575 = vmatprep.mubr.msk.f32.mxu1 %vm634_vm1, %v633_v2  ;;  %v341_v17 = vsub.s32 0, %v340_v12  ;;  %s526_s6 = sshll.u32 %s639_s5, 4  ;;  %s527_s6 = int_to_ptr.vmem [resolvable:$true] %s526_s6 }
   0x9   :  { %571 = vmatmul.mubr.msk.f32.vlgmr.msra.gmra.mrb[2].mxu0 %vm181_vm3, %v180_v7  ;;  %576 = vmatmul.mubr.msk.f32.vlgmr.msra.gmra.mrb[2].mxu1 %vm181_vm3, %v260_v8  ;;  %s609_s22 = scalar_lea.vmem %s527_s6, 16  ;;  %s613_s23 = scalar_lea.vmem %s527_s6, 32 }
   0xa   :  { %586 = vmatprep.mubr.msk.f32.mxu0 %vm634_vm1, %v633_v2  ;;  %589 = vmatprep.subr.mxu1 %v633_v2  ;;  %v342_v20 = vrot.slane %v30_v19, %v341_v17  ;;  %p610_p0 = scmp.ne.s32.totalorder %s527_s6, %s609_s22  ;;  %p614_p1 = scmp.lt.s32.totalorder %s527_s6, %s527_s6 }
   0xb   :  { %591 = vmatprep.mubr.msk.f32.mxu1 %vm634_vm1, %v633_v2  ;;  %594 = vmatprep.subr.bf16.mxu0 %v635_v14  ;;  %p615_p2 = scmp.lt.s32.totalorder %s613_s23, %s609_s22 }
   0xc   :  { %596 = vmatpush3.bf16.msra.mxu0 %v595_v13  ;;  %352 = vrot.lane.b32.xlu0 %v342_v20, %s636_s20 }
   0xd   :  { %597 = vmatprep.subr.bf16.mxu0 %v635_v14  ;;  %607 = vset.pattern.permute.xlu1 %v638_v35  ;;  %p616_p3 = por %p615_p2, %p614_p1 }
   0xe   :  { %608 = vset.pattern.permute.xlu0 %v638_v35  ;;  %433 = vperm.xlu1 %607, %v30_v19  }
   0xf   :  { %p617_p4 = pnand %p616_p3, %p610_p0 }
  0x10   :  { %599 = vmatpush3.bf16.msra.mxu0 %v598_v18  ;;  %440 = vrot.lane.b32.xlu0 %v342_v20, %s637_s21 }
  0x7e   :  { %v353_v36 = vpop.permute.xlu0 %352 }
  0x82   :  { %v441_v42 = vpop.permute.xlu0 %440 }
  0x8d   :  { %v434_v43 = vpop.permute.xlu1 %433 }
  0x8e   :  { %v439_v44 = vrot.slane %v434_v43, %v341_v17 }
  0xd8   :  { %v103_v21 = vpop.f32.mrb[0].mxu0  ;;  %v176_v22 = vpop.f32.mrb[0].mxu1 }
  0xd9   :  { %v177_v23 = vadd.f32 %v176_v22, %v103_v21  ;;  %v562_v24 = vpop.f32.mrb[1].mxu0  ;;  %v567_v25 = vpop.f32.mrb[1].mxu1 }
  0xdc   :  { %v255_v26 = vpop.f32.mrb[2].mxu0  ;;  %v333_v27 = vpop.f32.mrb[2].mxu1 }
  0xdd   :  { %v259_v28 = vadd.f32 %v255_v26, %v177_v23  ;;  %v572_v29 = vpop.f32.mrb[3].mxu0  ;;  %v577_v30 = vpop.f32.mrb[3].mxu1 }
  0xdf   :  { %v337_v31 = vadd.f32 %v333_v27, %v259_v28 }
  0xe1   :  { %v344_v32 = vadd.f32 %v342_v20, %v337_v31 }
  0xe3   :  { %vm345_vm4 = vcmp.gt.f32.partialorder %v344_v32, 0.0  ;;  %v346_v33 = vmul.f32 0.01, %v344_v32 }
  0xe5   :  { %v347_v34 = vsel %vm345_vm4, %v344_v32, %v346_v33 }
  0xe6   :  { %587 = vmatmul.mubr.msk.f32.vlgmr.msra.gmra.mrb[4].mxu0 %vm355_vm5, %v347_v34 }
 0x1b9   :  { %v425_v37 = vpop.f32.mrb[4].mxu0 }
 0x1ba   :  { %v426_v38 = vadd.f32 %v425_v37, %v353_v36  ;;  %v588_v39 = vpop.f32.mrb[5].mxu0 }
 0x1bc   :  { %vm429_vm6 = vcmp.gt.f32.partialorder %v426_v38, 0.0  ;;  %v430_v40 = vmul.f32 0.01, %v426_v38 }
 0x1be   :  { %v431_v41 = vsel %vm429_vm6, %v426_v38, %v430_v40 }
 0x1bf   :  { %590 = vmatpush3.xpose.msk.msra.mxu1 %vm442_vm7, %v431_v41 }
 0x1c2   :  { %592 = vmatmul.mubr.msk.f32.vlgmr.msra.gmra.mrb[4].mxu1 %vm442_vm7, %v441_v42 }
 0x295   :  { %v514_v45 = vpop.f32.mrb[4].mxu1 }
 0x296   :  { %v515_v46 = vadd.f32 %v514_v45, %v439_v44  ;;  %v593_v47 = vpop.f32.mrb[5].mxu1 }
 0x298   :  { %519 = vst.msk [vmem:[#allocation2] sm:$0x1] %vm518_vm8, %v515_v46 }
 0x299   :  { %620 = shalt.err (!%p617_p4)
}
 0x29a   :  { %s621_s26 = scalar_lea.hbm %s741_s7, 16 }
 0x29b   :  { %p622_p5 = scmp.ne.s32.totalorder %s741_s7, %s621_s26  ;;  %p625_p6 = scmp.lt.u32.totalorder %s621_s26, %s741_s7 }
 0x29d   :  { %p627_p7 = pnand %p625_p6, %p622_p5 }
 0x29f   :  { %630 = shalt.err (!%p627_p7)
}
 0x2a0   :  { %529 = dma.vmem_to_hbm [thread:$0]  %s527_s6, 16, %s741_s7, [#allocation3]  }
 0x2a1   :  { %631 = dma.done.wait [#allocation3], 16  }
 0x2a2   :  { %632 = vsyncadd [#allocation3], 4294967280 }
 0x2a3   :  { %533 = vsyncpa [#allocation3], 1 }

</bundles_post_ra>
